<compile_context>
chip_gen: v7x
topology: tpu7x:2x2x1
jax: 0.10.0
libtpu: 0.0.40
codegen_flags: <defaults>
</compile_context>

<pallas_src>
import functools

import jax
import jax.numpy as jnp
from jax import lax
from jax.experimental import pallas as pl
from jax.experimental.pallas import tpu as pltpu


# -------------------------- Pallas kernel --------------------------------- #
def _cutout_kernel(x_ref, mask_ref, o_ref):
    """x_ref / o_ref: VMEM (r_tile, H*W) lane-dense blocks (one row == one
    (sample, channel)).  mask_ref: VMEM (1, H*W) f32 0/1 fused box mask,
    identical for every grid step (index_map pins it to block (0, 0))."""
    x = x_ref[...]                                        # (R, HW) f32
    # per-row spatial mean == tensor.mean(dim=(2,3)).view(-1, 3, 1, 1)
    mean = jnp.mean(x, axis=-1, keepdims=True)            # (R, 1)
    m = mask_ref[...]                                     # (1, HW) f32 0/1
    # Broadcast select: (1,HW) mask x (R,1) mean x (R,HW) data -> (R,HW).
    o_ref[...] = jnp.where(m != 0.0, mean, x)


# ----------------------------- wrappers ------------------------------------ #
def sample_boxes(key, *, count, min_size, max_size, H, W):
    """Mirror the torch.randint calls of the reference module."""
    assert min_size < max_size, "min_size must be < max_size (torch.randint semantics)"
    k_sz, k_si, k_sj = jax.random.split(key, 3)
    sz = jax.random.randint(k_sz, (count,), min_size, max_size, dtype=jnp.int32)
    si = jax.random.randint(k_si, (count,), 0, H - sz, dtype=jnp.int32)
    sj = jax.random.randint(k_sj, (count,), 0, W - sz, dtype=jnp.int32)
    return jnp.stack([si, sj, sz], axis=-1).astype(jnp.int32)      # (count, 3)


def _build_fused_mask(boxes, H, W):
    """OR of all box masks, as a (1, H*W) float32 0/1 array (plain JAX, tiny).

    OR-fusing is equivalent to the reference's sequential fills because every
    box writes the same value (the per-channel mean of the ORIGINAL input,
    computed before any fill)."""
    row = lax.broadcasted_iota(jnp.int32, (H, W), 0)
    col = lax.broadcasted_iota(jnp.int32, (H, W), 1)
    mask = None
    for it in range(boxes.shape[0]):                      # count is static
        si, sj, sz = boxes[it, 0], boxes[it, 1], boxes[it, 2]
        m = (row >= si) & (row < si + sz) & (col >= sj) & (col < sj + sz)
        mask = m if mask is None else (mask | m)
    if mask is None:                                      # count == 0
        mask = jnp.zeros((H, W), dtype=jnp.bool_)
    return mask.reshape(1, H * W).astype(jnp.float32)


def cutout_from_boxes(x, boxes, *, row_tile=1024, donate_input=False):
    """Pallas Cutout given precomputed boxes. x: (N, 3, 32, 32) float32."""
    assert x.dtype == jnp.float32
    assert x.ndim == 4 and x.shape[1:] == (3, 32, 32)
    N, C, H, W = x.shape
    R, HW = N * C, H * W

    # Lane-dense layout: free contiguous reshape (N, C, H, W) -> (N*C, H*W).
    x2 = x.reshape(R, HW)

    # Row-invariant, grid-invariant fused box mask, built once (4 KiB).
    mask_f = _build_fused_mask(boxes, H, W)               # (1, HW) f32 0/1

    # Row tiling: single full-extent block for small inputs; 1024-row (4 MiB)
    # blocks for large ones.  16 MiB total double-buffered for in+out, under
    # the 32 MiB vmem limit below and well under v7x's 64 MiB physical VMEM.
    r_tile = R if R <= row_tile else row_tile
    grid = (pl.cdiv(R, r_tile),)

    extra = {}
    if donate_input:
        # operands are (x2, mask_f); x2 is operand 0, aliased to output 0.
        extra["input_output_aliases"] = {0: 0}

    out2 = pl.pallas_call(
        _cutout_kernel,
        out_shape=jax.ShapeDtypeStruct((R, HW), jnp.float32),
        grid=grid,
        in_specs=[
            pl.BlockSpec((r_tile, HW), lambda i: (i, 0)),
            pl.BlockSpec((1, HW), lambda i: (0, 0)),       # same mask every step
        ],
        out_specs=pl.BlockSpec((r_tile, HW), lambda i: (i, 0)),
        compiler_params=pltpu.CompilerParams(
            dimension_semantics=("parallel",),             # rows independent
            vmem_limit_bytes=32 * 1024 * 1024,             # 1024-row tiles on v5e
        ),
        cost_estimate=pl.CostEstimate(
            flops=2 * R * HW,                              # mean reduce + select
            transcendentals=0,
            bytes_accessed=2 * R * HW * 4 + HW * 4,        # read + write + mask
        ),
        **extra,
    )(x2, mask_f)

    return out2.reshape(N, C, H, W)


def cutout(x, key, *, count, min_size, max_size):
    """Full Cutout: sample boxes then apply the Pallas kernel."""
    H, W = x.shape[2], x.shape[3]
    boxes = sample_boxes(key, count=count, min_size=min_size,
                         max_size=max_size, H=H, W=W)
    return cutout_from_boxes(x, boxes)


# -------------------------- pure-JAX reference ------------------------------ #
def _cutout_ref(x, boxes):
    N, C, H, W = x.shape
    mean = jnp.mean(x, axis=(2, 3), keepdims=True)
    row = lax.broadcasted_iota(jnp.int32, (1, 1, H, W), 2)
    col = lax.broadcasted_iota(jnp.int32, (1, 1, H, W), 3)
    out = x
    for it in range(boxes.shape[0]):
        si, sj, sz = boxes[it, 0], boxes[it, 1], boxes[it, 2]
        m = (row >= si) & (row < si + sz) & (col >= sj) & (col < sj + sz)
        out = jnp.where(m, mean, out)
    return out


# ------------------------------- main -------------------------------------- #
if __name__ == "__main__":
    config = {"cutout_count": 2, "cutout_min_size": 4, "cutout_max_size": 8}

    key = jax.random.PRNGKey(0)
    k_data, k_box = jax.random.split(key)

    # module-consistent input: the forward asserts shape[1:] == (3, 32, 32)
    x = jax.random.normal(k_data, (2, 3, 32, 32), dtype=jnp.float32)

    boxes = sample_boxes(
        k_box,
        count=config["cutout_count"],
        min_size=config["cutout_min_size"],
        max_size=config["cutout_max_size"],
        H=x.shape[2],
        W=x.shape[3],
    )

    out = cutout_from_boxes(x, boxes)
    jax.block_until_ready(out)

    assert out.shape == x.shape and out.dtype == jnp.float32
    ref = _cutout_ref(x, boxes)
    assert bool(jnp.allclose(out, ref, atol=1e-6, rtol=1e-6)), "mismatch vs reference"

    print("KERNEL_OK")
</pallas_src>

<mosaic_0001>
module attributes {stable_mosaic.version = 11 : i64} {
  func.func @_cutout_kernel(%arg0: i32, %arg1: memref<6x1024xf32, #tpu.memory_space<vmem>>, %arg2: memref<1x1024xf32, #tpu.memory_space<vmem>>, %arg3: memref<6x1024xf32, #tpu.memory_space<vmem>>) attributes {dimension_semantics = [#tpu.dimension_semantics<parallel>], iteration_bounds = array<i64: 1>, scalar_prefetch = 0 : i64, scratch_operands = 0 : i64, tpu.core_type = #tpu.core_type<tc>, window_params = [{transform_indices = @transform_0, window_bounds = array<i64: 6, 1024>}, {pipeline_mode = #tpu.pipeline_mode<synchronous>, transform_indices = @transform_1, window_bounds = array<i64: 1, 1024>}, {transform_indices = @transform_2, window_bounds = array<i64: 6, 1024>}]} {
    %c0 = arith.constant 0 : index
    %c0_0 = arith.constant 0 : index
    %0 = vector.load %arg1[%c0, %c0_0] : memref<6x1024xf32, #tpu.memory_space<vmem>>, vector<6x1024xf32>
    %cst = arith.constant dense<0.000000e+00> : vector<6xf32>
    %1 = vector.multi_reduction <add>, %0, %cst [1] : vector<6x1024xf32> to vector<6xf32>
    %2 = vector.shape_cast %1 : vector<6xf32> to vector<6x1xf32>
    %cst_1 = arith.constant 1.024000e+03 : f32
    %3 = vector.broadcast %cst_1 : f32 to vector<6x1xf32>
    %4 = arith.divf %2, %3 : vector<6x1xf32>
    %c0_2 = arith.constant 0 : index
    %c0_3 = arith.constant 0 : index
    %5 = vector.load %arg2[%c0_2, %c0_3] : memref<1x1024xf32, #tpu.memory_space<vmem>>, vector<1x1024xf32>
    %cst_4 = arith.constant 0.000000e+00 : f32
    %6 = vector.broadcast %cst_4 : f32 to vector<1x1024xf32>
    %7 = arith.cmpf one, %5, %6 : vector<1x1024xf32>
    %8 = vector.shape_cast %7 : vector<1x1024xi1> to vector<1x1024xi1>
    %9 = vector.broadcast %8 : vector<1x1024xi1> to vector<6x1024xi1>
    %10 = vector.shape_cast %4 : vector<6x1xf32> to vector<6x1xf32>
    %11 = vector.broadcast %10 : vector<6x1xf32> to vector<6x1024xf32>
    %12 = arith.select %9, %11, %0 : vector<6x1024xi1>, vector<6x1024xf32>
    %c0_5 = arith.constant 0 : index
    %c0_6 = arith.constant 0 : index
    %13 = vector.load %arg3[%c0_5, %c0_6] : memref<6x1024xf32, #tpu.memory_space<vmem>>, vector<6x1024xf32>
    tpu.vector_store %arg3[%c0_5, %c0_6], %12 {strides = array<i32>} : memref<6x1024xf32, #tpu.memory_space<vmem>>, vector<6x1024xf32>,
    return
  }
  func.func @transform_0(%arg0: i32) -> (i32, i32) {
    %c0_i32 = arith.constant 0 : i32
    %c0_i32_0 = arith.constant 0 : i32
    return %arg0, %c0_i32 : i32, i32
  }
  func.func @transform_1(%arg0: i32) -> (i32, i32) {
    %c0_i32 = arith.constant 0 : i32
    %c0_i32_0 = arith.constant 0 : i32
    %c0_i32_1 = arith.constant 0 : i32
    return %c0_i32, %c0_i32_0 : i32, i32
  }
  func.func @transform_2(%arg0: i32) -> (i32, i32) {
    %c0_i32 = arith.constant 0 : i32
    %c0_i32_0 = arith.constant 0 : i32
    return %arg0, %c0_i32 : i32, i32
  }
}

</mosaic_0001>

<bundles_post_ra>
// kernel: tpu_custom_call.1
= control target key start
LH: loop header
LB: loop body
LE: loop exit
PB: predicated region body
PF: predicated region fallthrough
CT: control target
= control target key end

     0   :  { %7 = vsyncpa [#allocation3], 0  ;;  %s278_s0 = inlined_call_operand.hbm [shape: f32[6,1024], index: 0, kind: input, shape index: {}]   ;;  %s279_s1 = inlined_call_operand.hbm [shape: f32[1,1024], index: 1, kind: input, shape index: {}]   ;;  %s280_s2 = inlined_call_operand.hbm [shape: f32[6,1024], index: 2, kind: output, shape index: {}]  }
   0x1   :  { %8 = vsyncpa [#allocation6], 0 }
   0x2   :  { %9 = vsyncpa [#allocation4], 0  ;;  %s215_s9 = smov [#allocation2]   ;;  %s216_s11 = smov [#allocation5]  }
   0x3   :  { %s16_s10 = sshll.u32 %s215_s9, 4  ;;  %s26_s12 = sshll.u32 %s216_s11, 4  ;;  %s17_s10 = int_to_ptr.vmem [resolvable:$true] %s16_s10  ;;  %s27_s12 = int_to_ptr.vmem [resolvable:$true] %s26_s12 }
   0x4   :  { %s143_s15 = scalar_lea.hbm %s278_s0, 1024 }
   0x5   :  { %p144_p0 = scmp.ne.s32.totalorder %s278_s0, %s143_s15  ;;  %p147_p1 = scmp.lt.u32.totalorder %s143_s15, %s278_s0 }
   0x7   :  { %p149_p2 = pnand %p147_p1, %p144_p0 }
   0x9   :  { %152 = shalt.err (!%p149_p2)
}
   0xa   :  { %s153_s20 = scalar_lea.vmem %s17_s10, 1024  ;;  %p158_p4 = scmp.lt.s32.totalorder %s17_s10, %s17_s10 }
   0xb   :  { %p154_p3 = scmp.ne.s32.totalorder %s17_s10, %s153_s20  ;;  %p159_p5 = scmp.lt.s32.totalorder %s153_s20, %s153_s20 }
   0xd   :  { %p160_p6 = por %p159_p5, %p158_p4 }
   0xf   :  { %p161_p7 = pnand %p160_p6, %p154_p3 }
  0x11   :  { %164 = shalt.err (!%p161_p7)
}
  0x12   :  { %19 = dma.hbm_to_vmem [thread:$0]  %s278_s0, 1024, %s17_s10, [#allocation3]  }
  0x13   :  { %s165_s25 = scalar_lea.hbm %s279_s1, 128 }
  0x14   :  { %p166_p8 = scmp.ne.s32.totalorder %s279_s1, %s165_s25  ;;  %p169_p9 = scmp.lt.u32.totalorder %s165_s25, %s279_s1 }
  0x16   :  { %p171_p10 = pnand %p169_p9, %p166_p8 }
  0x18   :  { %174 = shalt.err (!%p171_p10)
}
  0x19   :  { %s175_s30 = scalar_lea.vmem %s27_s12, 128  ;;  %p180_p12 = scmp.lt.s32.totalorder %s27_s12, %s27_s12 }
  0x1a   :  { %p176_p11 = scmp.ne.s32.totalorder %s27_s12, %s175_s30  ;;  %p181_p13 = scmp.lt.s32.totalorder %s175_s30, %s175_s30 }
  0x1c   :  { %p182_p0 = por %p181_p13, %p180_p12 }
  0x1e   :  { %p183_p1 = pnand %p182_p0, %p176_p11 }
  0x20   :  { %186 = shalt.err (!%p183_p1)
}
  0x21   :  { %29 = dma.hbm_to_vmem [thread:$0]  %s279_s1, 128, %s27_s12, [#allocation6]  }
  0x22   :  { %209 = dma.done.wait [#allocation3], 1024  }
  0x23   :  { %210 = vsyncadd [#allocation3], 4294966272 }
  0x24   :  { %211 = dma.done.wait [#allocation6], 128  }
  0x25   :  { %212 = vsyncadd [#allocation6], 4294967168  ;;  %vm44_vm0 = vcmask 1045504   ;;  %v36_v0 = vld [vmem:[#allocation2] sm:$0x3f]  ;;  %v67_v23 = vlaneseq  ;;  %v217_v28 = vmov 0  }
  0x26   :  { %v37_v1 = vld [vmem:[#allocation2 + $0x8] sm:$0x3f]  ;;  %v38_v2 = vld [vmem:[#allocation2 + $0x10] sm:$0x3f]  ;;  %v39_v3 = vld [vmem:[#allocation2 + $0x18] sm:$0x3f] }
  0x27   :  { %v45_v4 = vsel %vm44_vm0, %v36_v0, 0.0  ;;  %v46_v5 = vsel %vm44_vm0, %v37_v1, 0.0  ;;  %v40_v6 = vld [vmem:[#allocation2 + $0x20] sm:$0x3f]  ;;  %v48_v8 = vsel %vm44_vm0, %v38_v2, 0.0  ;;  %v50_v9 = vsel %vm44_vm0, %v39_v3, 0.0 }
  0x28   :  { %v47_v7 = vadd.f32 %v46_v5, %v45_v4  ;;  %v41_v10 = vld [vmem:[#allocation2 + $0x28] sm:$0x3f]  ;;  %v52_v12 = vsel %vm44_vm0, %v40_v6, 0.0  ;;  %v42_v13 = vld [vmem:[#allocation2 + $0x30] sm:$0x3f]  ;;  %v64_v24 = vld [vmem:[#allocation5] sm:$0xff] }
  0x29   :  { %v54_v15 = vsel %vm44_vm0, %v41_v10, 0.0  ;;  %v43_v16 = vld [vmem:[#allocation2 + $0x38] sm:$0x3f]  ;;  %v56_v18 = vsel %vm44_vm0, %v42_v13, 0.0  ;;  %v68_v25 = vshrl.u32 %v67_v23, 7  ;;  %vm65_vm1 = vcmp.ne.f32.partialorder %v64_v24, 0.0 }
  0x2a   :  { %v49_v11 = vadd.f32 %v48_v8, %v47_v7  ;;  %v58_v20 = vsel %vm44_vm0, %v43_v16, 0.0  ;;  %v66_v29 = vsel %vm65_vm1, 1, %v217_v28  ;;  %s218_s1 = smov [#allocation7]  }
  0x2b   :  { %v69_v26 = vsub.s32 0, %v68_v25  ;;  %v73_v27 = vsub.s32 1, %v68_v25  ;;  %v77_v30 = vsub.s32 2, %v68_v25  ;;  %v81_v31 = vsub.s32 3, %v68_v25  ;;  %s129_s4 = sshll.u32 %s218_s1, 4  ;;  %s130_s4 = int_to_ptr.vmem [resolvable:$true] %s129_s4 }
  0x2c   :  { %v51_v14 = vadd.f32 %v50_v9, %v49_v11  ;;  %v85_v32 = vsub.s32 4, %v68_v25  ;;  %v89_v33 = vsub.s32 5, %v68_v25  ;;  %v93_v34 = vsub.s32 6, %v68_v25  ;;  %s187_s5 = scalar_lea.vmem %s130_s4, 1024  ;;  %p192_p3 = scmp.lt.s32.totalorder %s130_s4, %s130_s4 }
  0x2d   :  { %v97_v35 = vsub.s32 7, %v68_v25  ;;  %v70_v36 = vrot.slane %v66_v29, %v69_v26  ;;  %v74_v37 = vrot.slane %v66_v29, %v73_v27  ;;  %v78_v38 = vrot.slane %v66_v29, %v77_v30  ;;  %p188_p2 = scmp.ne.s32.totalorder %s130_s4, %s187_s5  ;;  %p193_p4 = scmp.lt.s32.totalorder %s187_s5, %s187_s5 }
  0x2e   :  { %v53_v17 = vadd.f32 %v52_v12, %v51_v14  ;;  %v82_v39 = vrot.slane %v66_v29, %v81_v31  ;;  %v86_v40 = vrot.slane %v66_v29, %v85_v32  ;;  %v90_v41 = vrot.slane %v66_v29, %v89_v33 }
  0x2f   :  { %v94_v42 = vrot.slane %v66_v29, %v93_v34  ;;  %v98_v43 = vrot.slane %v66_v29, %v97_v35  ;;  %vm99_vm2 = vcmp.eq.s32.totalorder %v70_v36, 1  ;;  %vm100_vm3 = vcmp.eq.s32.totalorder %v74_v37, 1  ;;  %p194_p5 = por %p193_p4, %p192_p3 }
  0x30   :  { %v55_v19 = vadd.f32 %v54_v15, %v53_v17  ;;  %vm101_vm4 = vcmp.eq.s32.totalorder %v78_v38, 1  ;;  %vm102_vm5 = vcmp.eq.s32.totalorder %v82_v39, 1  ;;  %vm103_vm6 = vcmp.eq.s32.totalorder %v86_v40, 1 }
  0x31   :  { %vm104_vm7 = vcmp.eq.s32.totalorder %v90_v41, 1  ;;  %vm105_vm8 = vcmp.eq.s32.totalorder %v94_v42, 1  ;;  %vm106_vm9 = vcmp.eq.s32.totalorder %v98_v43, 1  ;;  %p195_p6 = pnand %p194_p5, %p188_p2 }
  0x32   :  { %v57_v21 = vadd.f32 %v56_v18, %v55_v19 }
  0x34   :  { %v59_v22 = vadd.f32 %v58_v20, %v57_v21 }
  0x36   :  { %60 = vadd.xlane.f32.xlu0 %v59_v22 }
  0xc3   :  { %v61_v44 = vpop.xlane.xlu0 %60 }
  0xc4   :  { %v63_v45 = vmul.f32 0.0009765625, %v61_v44 }
  0xc6   :  { %v107_v46 = vsel %vm99_vm2, %v63_v45, %v36_v0  ;;  %v108_v47 = vsel %vm100_vm3, %v63_v45, %v37_v1  ;;  %v109_v48 = vsel %vm101_vm4, %v63_v45, %v38_v2  ;;  %v110_v49 = vsel %vm102_vm5, %v63_v45, %v39_v3 }
  0xc7   :  { %v111_v50 = vsel %vm103_vm6, %v63_v45, %v40_v6  ;;  %v112_v51 = vsel %vm104_vm7, %v63_v45, %v41_v10  ;;  %v113_v52 = vsel %vm105_vm8, %v63_v45, %v42_v13  ;;  %v114_v53 = vsel %vm106_vm9, %v63_v45, %v43_v16  ;;  %115 = vst [vmem:[#allocation7] sm:$0x3f] %v107_v46 }
  0xc8   :  { %116 = vst [vmem:[#allocation7 + $0x8] sm:$0x3f] %v108_v47  ;;  %117 = vst [vmem:[#allocation7 + $0x10] sm:$0x3f] %v109_v48 }
  0xc9   :  { %118 = vst [vmem:[#allocation7 + $0x18] sm:$0x3f] %v110_v49  ;;  %119 = vst [vmem:[#allocation7 + $0x20] sm:$0x3f] %v111_v50 }
  0xca   :  { %120 = vst [vmem:[#allocation7 + $0x28] sm:$0x3f] %v112_v51  ;;  %121 = vst [vmem:[#allocation7 + $0x30] sm:$0x3f] %v113_v52 }
  0xcb   :  { %122 = vst [vmem:[#allocation7 + $0x38] sm:$0x3f] %v114_v53 }
  0xcc   :  { %198 = shalt.err (!%p195_p6)
}
  0xcd   :  { %s199_s8 = scalar_lea.hbm %s280_s2, 1024 }
  0xce   :  { %p200_p7 = scmp.ne.s32.totalorder %s280_s2, %s199_s8  ;;  %p203_p8 = scmp.lt.u32.totalorder %s199_s8, %s280_s2 }
  0xd0   :  { %p205_p9 = pnand %p203_p8, %p200_p7 }
  0xd2   :  { %208 = shalt.err (!%p205_p9)
}
  0xd3   :  { %132 = dma.vmem_to_hbm [thread:$0]  %s130_s4, 1024, %s280_s2, [#allocation4]  }
  0xd4   :  { %213 = dma.done.wait [#allocation4], 1024  }
  0xd5   :  { %214 = vsyncadd [#allocation4], 4294966272 }
  0xd6   :  { %136 = vsyncpa [#allocation3], 1 }
  0xd7   :  { %137 = vsyncpa [#allocation6], 1 }
  0xd8   :  { %138 = vsyncpa [#allocation4], 1 }

</bundles_post_ra>
